<compile_context>
chip_gen: v5e
topology: v5e:2x2
jax: 0.10.0
libtpu: 0.0.40
codegen_flags: <defaults>
</compile_context>

<pallas_src>
import jax
import jax.numpy as jnp
from jax import lax
from jax.experimental import pallas as pl
from jax.experimental.pallas import tpu as pltpu


def _cam_kernel(patches_ref, w_ref, b_ref, o_ref):
    """Fused LearnableCAM body for one lane chunk (all batch elements in that chunk).

    patches_ref: (9*C, TL)  im2col^T (tap-major, channel-minor rows), lanes = batch*H*W
    w_ref:       (2*C, 9*C) combined dense-conv weights, branch0 rows then branch1 rows
    b_ref:       (2*C, 1)   combined biases
    o_ref:       (C, TL)    output chunk
    """
    C = o_ref.shape[0]
    # Residual = pre-ReLU center tap (offset (0,0)) of the im2col block == x itself.
    x = patches_ref[4 * C:5 * C, :]                                     # (C, TL)
    # pool(8) is identity at 8x8, and relu(0)=0, so relu(patches(x)) == patches(relu(pool(x))).
    p = jnp.maximum(patches_ref[...], 0.0)                              # (9C, TL)
    # Both branches' folded dense 3x3 convs as a single MXU matmul.
    r = jnp.dot(w_ref[...], p, preferred_element_type=jnp.float32)      # (2C, TL)
    f = jnp.maximum(r + b_ref[...], 0.0)                                # bias + ReLU
    s = f[:C, :] + f[C:, :]                                             # branch sum, s >= 0
    e = jnp.exp(-s)                                                     # EUP exp, in (0, 1]
    sig = pl.reciprocal(1.0 + e, approx=True)                           # EUP recip, denom in (1, 2]
    o_ref[...] = (x + sig * s).astype(o_ref.dtype)                      # residual add


@jax.jit
def learnable_cam(x, w_dw0, b_dw0, w_pw0, b_pw0, w_dw1, b_dw1, w_pw1, b_pw1):
    """x: (N, C, 8, 8); w_dw*: (C,1,3,3); b_dw*: (C,); w_pw*: (C,C,1,1); b_pw*: (C,)."""
    N, C, H, W = x.shape
    # The PyTorch module's `x + ax` only broadcasts when x is already 8x8 spatially.
    assert H == 8 and W == 8, "LearnableCAM requires 8x8 spatial input"
    HW = H * W

    # Pad the batch so the packed lane axis (NB*HW) is a multiple of 128.
    n_pad = (-N) % (128 // HW)
    if n_pad:
        x = jnp.pad(x, ((0, n_pad), (0, 0), (0, 0), (0, 0)))
    NB = N + n_pad
    L = NB * HW                                                          # total lane width

    # --- glue (layout plumbing only): lane-dense im2col^T, rows tap-major/channel-minor ---
    xT = x.transpose(1, 0, 2, 3)                                         # (C, NB, H, W)
    xpad = jnp.pad(xT, ((0, 0), (0, 0), (1, 1), (1, 1)))
    taps = [xpad[:, :, dy:dy + H, dx:dx + W].reshape(C, L)
            for dy in range(3) for dx in range(3)]
    patches = jnp.concatenate(taps, axis=0)                              # (9C, NB*HW)

    # --- glue: fold depthwise(3x3)+pointwise(1x1) into one dense 3x3 conv per branch ---
    def combine(w_dw, b_dw, w_pw, b_pw):
        wd = w_dw.reshape(C, 9)                                          # [c, k], k = ky*3+kx
        wp = w_pw.reshape(C, C)                                          # [co, c]
        wmat = (wp[:, None, :] * wd.T[None, :, :]).reshape(C, 9 * C)     # [co, k*C + c]
        bvec = wp @ b_dw + b_pw                                          # (C,)
        return wmat, bvec

    w0, c0 = combine(w_dw0, b_dw0, w_pw0, b_pw0)
    w1, c1 = combine(w_dw1, b_dw1, w_pw1, b_pw1)
    w_cat = jnp.concatenate([w0, w1], axis=0)                            # (2C, 9C)
    b_cat = jnp.concatenate([c0, c1], axis=0)[:, None]                   # (2C, 1)

    # --- lane-chunk tiling: chunks are multiples of 128 lanes; keep >=2 grid steps when
    #     there is enough work (v7x megacore), collapse to one step for tiny batches. ---
    if NB <= 2:
        nb_per_block = NB
    else:
        nb_per_block = min(NB // 2, 64)                                  # cap ~4096 lanes/step
        nb_per_block -= nb_per_block % 2                                 # keep lanes % 128 == 0
        while NB % nb_per_block:
            nb_per_block -= 2
    TL = nb_per_block * HW
    grid = (L // TL,)

    out = pl.pallas_call(
        _cam_kernel,
        out_shape=jax.ShapeDtypeStruct((C, L), x.dtype),
        grid_spec=pltpu.PrefetchScalarGridSpec(
            num_scalar_prefetch=0,
            grid=grid,
            in_specs=[
                pl.BlockSpec((9 * C, TL), lambda j: (0, j)),
                pl.BlockSpec((2 * C, 9 * C), lambda j: (0, 0)),
                pl.BlockSpec((2 * C, 1), lambda j: (0, 0)),
            ],
            out_specs=pl.BlockSpec((C, TL), lambda j: (0, j)),
        ),
        compiler_params=pltpu.CompilerParams(dimension_semantics=("parallel",)),
    )(patches, w_cat, b_cat)

    out = out.reshape(C, NB, H, W).transpose(1, 0, 2, 3)                 # back to NCHW
    return out[:N] if n_pad else out


def _reference(x, w_dw0, b_dw0, w_pw0, b_pw0, w_dw1, b_dw1, w_pw1, b_pw1):
    """Pure-JAX reference (lax convs) mirroring the PyTorch forward, for verification."""
    C = x.shape[1]

    def branch(a, w_dw, b_dw, w_pw, b_pw):
        d = lax.conv_general_dilated(
            a, w_dw, window_strides=(1, 1), padding=((1, 1), (1, 1)),
            dimension_numbers=("NCHW", "OIHW", "NCHW"), feature_group_count=C)
        d = d + b_dw[None, :, None, None]
        p = lax.conv_general_dilated(
            d, w_pw, window_strides=(1, 1), padding=((0, 0), (0, 0)),
            dimension_numbers=("NCHW", "OIHW", "NCHW"))
        p = p + b_pw[None, :, None, None]
        return jnp.maximum(p, 0.0)

    a = jnp.maximum(x, 0.0)   # AdaptiveAvg/MaxPool2d(8) at 8x8 == identity, then ReLU
    f0 = branch(a, w_dw0, b_dw0, w_pw0, b_pw0)
    f1 = branch(a, w_dw1, b_dw1, w_pw1, b_pw1)
    s = f0 + f1
    return x + jax.nn.sigmoid(s) * s


if __name__ == "__main__":
    # Module config: LearnableCAM(channels=32, mode=0); input spatial must be 8x8.
    N, C, H, W = 2, 32, 8, 8

    key = jax.random.PRNGKey(0)
    ks = jax.random.split(key, 9)
    x = jax.random.normal(ks[0], (N, C, H, W), dtype=jnp.float32)
    # Branch 0 (avg-pool path) and branch 1 (max-pool path) DWSConv params (PyTorch layouts).
    w_dw0 = 0.1 * jax.random.normal(ks[1], (C, 1, 3, 3), dtype=jnp.float32)
    b_dw0 = 0.1 * jax.random.normal(ks[2], (C,), dtype=jnp.float32)
    w_pw0 = 0.1 * jax.random.normal(ks[3], (C, C, 1, 1), dtype=jnp.float32)
    b_pw0 = 0.1 * jax.random.normal(ks[4], (C,), dtype=jnp.float32)
    w_dw1 = 0.1 * jax.random.normal(ks[5], (C, 1, 3, 3), dtype=jnp.float32)
    b_dw1 = 0.1 * jax.random.normal(ks[6], (C,), dtype=jnp.float32)
    w_pw1 = 0.1 * jax.random.normal(ks[7], (C, C, 1, 1), dtype=jnp.float32)
    b_pw1 = 0.1 * jax.random.normal(ks[8], (C,), dtype=jnp.float32)

    out = learnable_cam(x, w_dw0, b_dw0, w_pw0, b_pw0, w_dw1, b_dw1, w_pw1, b_pw1)
    out = jax.block_until_ready(out)

    ref = _reference(x, w_dw0, b_dw0, w_pw0, b_pw0, w_dw1, b_dw1, w_pw1, b_pw1)
    assert out.shape == (N, C, H, W), out.shape
    # Tolerance relaxed vs v1 because sigmoid uses the EUP approximate reciprocal.
    assert jnp.allclose(out, ref, atol=1e-2, rtol=1e-2), "mismatch vs reference"

    print("KERNEL_OK")
</pallas_src>

<mosaic_0001>
module attributes {stable_mosaic.version = 11 : i64} {
  func.func @_cam_kernel(%arg0: i32, %arg1: memref<288x128xf32, #tpu.memory_space<vmem>>, %arg2: memref<64x288xf32, #tpu.memory_space<vmem>>, %arg3: memref<64x1xf32, #tpu.memory_space<vmem>>, %arg4: memref<32x128xf32, #tpu.memory_space<vmem>>) attributes {dimension_semantics = [#tpu.dimension_semantics<parallel>], iteration_bounds = array<i64: 1>, scalar_prefetch = 0 : i64, scratch_operands = 0 : i64, tpu.core_type = #tpu.core_type<tc>, window_params = [{transform_indices = @transform_0, window_bounds = array<i64: 288, 128>}, {pipeline_mode = #tpu.pipeline_mode<synchronous>, transform_indices = @transform_1, window_bounds = array<i64: 64, 288>}, {pipeline_mode = #tpu.pipeline_mode<synchronous>, transform_indices = @transform_2, window_bounds = array<i64: 64, 1>}, {transform_indices = @transform_3, window_bounds = array<i64: 32, 128>}]} {
    %c128 = arith.constant 128 : index
    %c0 = arith.constant 0 : index
    %0 = vector.load %arg1[%c128, %c0] : memref<288x128xf32, #tpu.memory_space<vmem>>, vector<32x128xf32>
    %c0_0 = arith.constant 0 : index
    %c0_1 = arith.constant 0 : index
    %1 = vector.load %arg1[%c0_0, %c0_1] : memref<288x128xf32, #tpu.memory_space<vmem>>, vector<288x128xf32>
    %cst = arith.constant 0.000000e+00 : f32
    %2 = vector.broadcast %cst : f32 to vector<288x128xf32>
    %3 = arith.maximumf %1, %2 : vector<288x128xf32>
    %c0_2 = arith.constant 0 : index
    %c0_3 = arith.constant 0 : index
    %4 = vector.load %arg2[%c0_2, %c0_3] : memref<64x288xf32, #tpu.memory_space<vmem>>, vector<64x288xf32>
    %cst_4 = arith.constant dense<0.000000e+00> : vector<64x128xf32>
    %5 = tpu.matmul %4, %3, %cst_4 {dimension_numbers = #tpu.dot_dimension_numbers<[1], [0], [0], [1], [0, 0, 1, 1], [], []>} : vector<64x288xf32>, vector<288x128xf32>, vector<64x128xf32> -> vector<64x128xf32>
    %c0_5 = arith.constant 0 : index
    %c0_6 = arith.constant 0 : index
    %6 = vector.load %arg3[%c0_5, %c0_6] : memref<64x1xf32, #tpu.memory_space<vmem>>, vector<64x1xf32>
    %7 = vector.broadcast %6 : vector<64x1xf32> to vector<64x128xf32>
    %8 = arith.addf %5, %7 : vector<64x128xf32>
    %cst_7 = arith.constant 0.000000e+00 : f32
    %9 = vector.broadcast %cst_7 : f32 to vector<64x128xf32>
    %10 = arith.maximumf %8, %9 : vector<64x128xf32>
    %11 = vector.extract_strided_slice %10 {offsets = [0, 0], sizes = [32, 128], strides = [1, 1]} : vector<64x128xf32> to vector<32x128xf32>
    %12 = vector.extract_strided_slice %10 {offsets = [32, 0], sizes = [32, 128], strides = [1, 1]} : vector<64x128xf32> to vector<32x128xf32>
    %13 = arith.addf %11, %12 : vector<32x128xf32>
    %cst_8 = arith.constant 0.000000e+00 : f32
    %14 = vector.broadcast %cst_8 : f32 to vector<32x128xf32>
    %15 = arith.subf %14, %13 : vector<32x128xf32>
    %16 = math.exp %15 : vector<32x128xf32>
    %cst_9 = arith.constant 1.000000e+00 : f32
    %17 = vector.broadcast %cst_9 : f32 to vector<32x128xf32>
    %18 = arith.addf %17, %16 : vector<32x128xf32>
    %19 = tpu.reciprocal %18 {approx = true} : vector<32x128xf32> -> vector<32x128xf32>
    %20 = arith.mulf %19, %13 : vector<32x128xf32>
    %21 = arith.addf %0, %20 : vector<32x128xf32>
    %c0_10 = arith.constant 0 : index
    %c0_11 = arith.constant 0 : index
    %22 = vector.load %arg4[%c0_10, %c0_11] : memref<32x128xf32, #tpu.memory_space<vmem>>, vector<32x128xf32>
    tpu.vector_store %arg4[%c0_10, %c0_11], %21 {strides = array<i32>} : memref<32x128xf32, #tpu.memory_space<vmem>>, vector<32x128xf32>,
    return
  }
  func.func @transform_0(%arg0: i32) -> (i32, i32) {
    %c0_i32 = arith.constant 0 : i32
    %c0_i32_0 = arith.constant 0 : i32
    return %c0_i32, %arg0 : i32, i32
  }
  func.func @transform_1(%arg0: i32) -> (i32, i32) {
    %c0_i32 = arith.constant 0 : i32
    %c0_i32_0 = arith.constant 0 : i32
    %c0_i32_1 = arith.constant 0 : i32
    return %c0_i32, %c0_i32_0 : i32, i32
  }
  func.func @transform_2(%arg0: i32) -> (i32, i32) {
    %c0_i32 = arith.constant 0 : i32
    %c0_i32_0 = arith.constant 0 : i32
    %c0_i32_1 = arith.constant 0 : i32
    return %c0_i32, %c0_i32_0 : i32, i32
  }
  func.func @transform_3(%arg0: i32) -> (i32, i32) {
    %c0_i32 = arith.constant 0 : i32
    %c0_i32_0 = arith.constant 0 : i32
    return %c0_i32, %arg0 : i32, i32
  }
}

</mosaic_0001>

<bundles_post_ra>
// kernel: learnable_cam.1
= control target key start
LH: loop header
LB: loop body
LE: loop exit
PB: predicated region body
PF: predicated region fallthrough
CT: control target
= control target key end

     0   :  { %vm162_vm0 = vcmask 261120   ;;  %v418_v49 = vmov 0   ;;  %s775_s0 = inlined_call_operand.vmem [shape: f32[288,128], index: 0, kind: input, shape index: {}]   ;;  %s776_s1 = inlined_call_operand.vmem [shape: f32[64,288], index: 1, kind: input, shape index: {}]   ;;  %s777_s2 = inlined_call_operand.vmem [shape: f32[64,1], index: 2, kind: input, shape index: {}]   ;;  %s778_s3 = inlined_call_operand.vmem [shape: f32[32,128], index: 3, kind: output, shape index: {}]  }
   0x1   :  { %v33_v0 = vld [vmem:[%s775_s0 + $0x78] sm:$0xff]  ;;  %v32_v1 = vld [vmem:[%s775_s0 + $0x70] sm:$0xff]  ;;  %v31_v6 = vld [vmem:[%s775_s0 + $0x68] sm:$0xff]  ;;  %399 = vset.pattern.permute.xlu0 %v418_v49  ;;  %400 = vset.pattern.permute.xlu1 %v418_v49 }
   0x2   :  { %v448_v2 = vld [vmem:[%s775_s0 + $0xf8] sm:$0xff]  ;;  %v69_v3 = vmax.f32 %v33_v0, 0.0  ;;  %v68_v4 = vmax.f32 %v32_v1, 0.0  ;;  %v457_v7 = vld [vmem:[%s775_s0 + $0xf0] sm:$0xff]  ;;  %v30_v9 = vld [vmem:[%s775_s0 + $0x60] sm:$0xff]  ;;  %v67_v11 = vmax.f32 %v31_v6, 0.0  ;;  %401 = vset.pattern.permute.xlu2 %v418_v49 }
   0x3   :  { %v85_v5 = vmax.f32 %v448_v2, 0.0  ;;  %v84_v8 = vmax.f32 %v457_v7, 0.0  ;;  %v466_v10 = vld [vmem:[%s775_s0 + $0xe8] sm:$0xff]  ;;  %v471_v12 = vld [vmem:[%s775_s0 + $0xe0] sm:$0xff]  ;;  %v53_v13 = vld [vmem:[%s775_s0 + $0x118] sm:$0xff]  ;;  %v66_v18 = vmax.f32 %v30_v9, 0.0 }
   0x4   :  { %187 = vmatpush.msra.mxu0 %v69_v3  ;;  %366 = vmatpush.msra.mxu3 %v69_v3  ;;  %v83_v14 = vmax.f32 %v466_v10, 0.0  ;;  %v29_v15 = vld [vmem:[%s775_s0 + $0x58] sm:$0xff]  ;;  %v89_v16 = vmax.f32 %v53_v13, 0.0  ;;  %v52_v17 = vld [vmem:[%s775_s0 + $0x110] sm:$0xff]  ;;  %v51_v21 = vld [vmem:[%s775_s0 + $0x108] sm:$0xff]  ;;  %v82_v22 = vmax.f32 %v471_v12, 0.0 }
   0x5   :  { %228 = vmatpush.msra.mxu1 %v85_v5  ;;  %v488_v19 = vld [vmem:[%s775_s0 + $0xd8] sm:$0xff]  ;;  %v88_v20 = vmax.f32 %v52_v17, 0.0  ;;  %v28_v23 = vld [vmem:[%s775_s0 + $0x50] sm:$0xff]  ;;  %v87_v24 = vmax.f32 %v51_v21, 0.0  ;;  %v50_v25 = vld [vmem:[%s775_s0 + $0x100] sm:$0xff]  ;;  %v65_v26 = vmax.f32 %v29_v15, 0.0 }
   0x6   :  { %188 = vmatpush.msra.mxu0 %v68_v4  ;;  %367 = vmatpush.msra.mxu3 %v68_v4  ;;  %v505_v27 = vld [vmem:[%s775_s0 + $0xd0] sm:$0xff]  ;;  %v81_v28 = vmax.f32 %v488_v19, 0.0  ;;  %v27_v29 = vld [vmem:[%s775_s0 + $0x48] sm:$0xff]  ;;  %v86_v30 = vmax.f32 %v50_v25, 0.0  ;;  %v64_v31 = vmax.f32 %v28_v23, 0.0  ;;  %v26_v34 = vld [vmem:[%s775_s0 + $0x40] sm:$0xff] }
   0x7   :  { %229 = vmatpush.msra.mxu1 %v84_v8  ;;  %281 = vmatpush.msra.mxu2 %v89_v16  ;;  %v516_v32 = vld [vmem:[%s775_s0 + $0xc8] sm:$0xff]  ;;  %v80_v33 = vmax.f32 %v505_v27, 0.0  ;;  %v63_v35 = vmax.f32 %v27_v29, 0.0  ;;  %v527_v36 = vld [vmem:[%s775_s0 + $0xc0] sm:$0xff]  ;;  %v92_v37 = vld [vmem:[%s776_s1 + $0x10] sm:$0xff]  ;;  %v62_v40 = vmax.f32 %v26_v34, 0.0 }
   0x8   :  { %189 = vmatpush.msra.mxu0 %v67_v11  ;;  %368 = vmatpush.msra.mxu3 %v67_v11  ;;  %v79_v38 = vmax.f32 %v516_v32, 0.0  ;;  %v25_v39 = vld [vmem:[%s775_s0 + $0x38] sm:$0xff]  ;;  %v78_v42 = vmax.f32 %v527_v36, 0.0  ;;  %v24_v43 = vld [vmem:[%s775_s0 + $0x30] sm:$0xff]  ;;  %v114_v46 = vld [vmem:[%s777_s2] sm:$0xff] }
   0x9   :  { %230 = vmatpush.msra.mxu1 %v83_v14  ;;  %282 = vmatpush.msra.mxu2 %v88_v20  ;;  %v541_v41 = vld [vmem:[%s775_s0 + $0xb8] sm:$0xff]  ;;  %v61_v44 = vmax.f32 %v25_v39, 0.0  ;;  %v553_v45 = vld [vmem:[%s775_s0 + $0xb0] sm:$0xff]  ;;  %v23_v48 = vld [vmem:[%s775_s0 + $0x28] sm:$0xff]  ;;  %v60_v50 = vmax.f32 %v24_v43, 0.0 }
   0xa   :  { %190 = vmatpush.msra.mxu0 %v66_v18  ;;  %369 = vmatpush.msra.mxu3 %v66_v18  ;;  %v77_v47 = vmax.f32 %v541_v41, 0.0  ;;  %v567_v51 = vld [vmem:[%s775_s0 + $0xa8] sm:$0xff]  ;;  %v76_v52 = vmax.f32 %v553_v45, 0.0  ;;  %v22_v53 = vld [vmem:[%s775_s0 + $0x20] sm:$0xff]  ;;  %v59_v54 = vmax.f32 %v23_v48, 0.0  ;;  %v21_v58 = vld [vmem:[%s775_s0 + $0x18] sm:$0xff] }
   0xb   :  { %231 = vmatpush.msra.mxu1 %v82_v22  ;;  %283 = vmatpush.msra.mxu2 %v87_v24  ;;  %v578_v55 = vld [vmem:[%s775_s0 + $0xa0] sm:$0xff]  ;;  %v95_v56 = vld [vmem:[%s776_s1 + $0x28] sm:$0xff]  ;;  %v75_v57 = vmax.f32 %v567_v51, 0.0  ;;  %v58_v59 = vmax.f32 %v22_v53, 0.0  ;;  %v592_v60 = vld [vmem:[%s775_s0 + $0x98] sm:$0xff]  ;;  %v57_v0 = vmax.f32 %v21_v58, 0.0 }
   0xc   :  { %191 = vmatpush.msra.mxu0 %v65_v26  ;;  %370 = vmatpush.msra.mxu3 %v65_v26  ;;  %v74_v61 = vmax.f32 %v578_v55, 0.0  ;;  %v20_v62 = vld [vmem:[%s775_s0 + $0x10] sm:$0xff]  ;;  %v115_v3 = vld [vmem:[%s777_s2 + $0x8] sm:$0xff]  ;;  %v73_v4 = vmax.f32 %v592_v60, 0.0  ;;  %v18_v15 = vld [vmem:[%s775_s0] sm:$0xff] }
   0xd   :  { %232 = vmatpush.msra.mxu1 %v81_v28  ;;  %284 = vmatpush.msra.mxu2 %v86_v30  ;;  %v116_v63 = vld [vmem:[%s777_s2 + $0x10] sm:$0xff]  ;;  %v19_v6 = vld [vmem:[%s775_s0 + $0x8] sm:$0xff]  ;;  %v56_v9 = vmax.f32 %v20_v62, 0.0  ;;  %v98_v17 = vld [vmem:[%s776_s1 + $0x40] sm:$0xff]  ;;  %v54_v21 = vmax.f32 %v18_v15, 0.0 }
   0xe   :  { %192 = vmatpush.msra.mxu0 %v64_v31  ;;  %371 = vmatpush.msra.mxu3 %v64_v31  ;;  %v607_v1 = vld [vmem:[%s775_s0 + $0x90] sm:$0xff]  ;;  %v621_v11 = vld [vmem:[%s775_s0 + $0x88] sm:$0xff]  ;;  %v55_v16 = vmax.f32 %v19_v6, 0.0  ;;  %v638_v20 = vld [vmem:[%s775_s0 + $0x80] sm:$0xff] }
   0xf   :  { %233 = vmatpush.msra.mxu1 %v80_v33  ;;  %358 = vmatmul.msk.f32.vlgmr.msra.gmra.mxu2 %vm162_vm0, %v92_v37  ;;  %v72_v13 = vmax.f32 %v607_v1, 0.0  ;;  %v71_v18 = vmax.f32 %v621_v11, 0.0  ;;  %v117_v23 = vld [vmem:[%s777_s2 + $0x18] sm:$0xff]  ;;  %v90_v24 = vld [vmem:[%s776_s1] sm:$0xff]  ;;  %v70_v25 = vmax.f32 %v638_v20, 0.0  ;;  %v108_v26 = vld [vmem:[%s776_s1 + $0x90] sm:$0xff] }
  0x10   :  { %193 = vmatpush.msra.mxu0 %v63_v35  ;;  %372 = vmatpush.msra.mxu3 %v63_v35  ;;  %v91_v29 = vld [vmem:[%s776_s1 + $0x8] sm:$0xff]  ;;  %v120_v30 = vld [vmem:[%s777_s2 + $0x30] sm:$0xff]  ;;  %v101_v31 = vld [vmem:[%s776_s1 + $0x58] sm:$0xff] }
  0x11   :  { %234 = vmatpush.msra.mxu1 %v79_v38  ;;  %124 = vperm.xlu0 %399, %v114_v46   ;;  %v121_v2 = vld [vmem:[%s777_s2 + $0x38] sm:$0xff]  ;;  %v111_v7 = vld [vmem:[%s776_s1 + $0xa8] sm:$0xff]  ;;  %v104_v10 = vld [vmem:[%s776_s1 + $0x70] sm:$0xff] }
  0x12   :  { %194 = vmatpush.msra.mxu0 %v62_v40  ;;  %373 = vmatpush.msra.mxu3 %v62_v40  ;;  %v118_v12 = vld [vmem:[%s777_s2 + $0x20] sm:$0xff]  ;;  %v97_v19 = vld [vmem:[%s776_s1 + $0x38] sm:$0xff]  ;;  %v107_v27 = vld [vmem:[%s776_s1 + $0x88] sm:$0xff] }
  0x13   :  { %235 = vmatpush.msra.mxu1 %v78_v42  ;;  %134 = vperm.xlu1 %400, %v116_v63   ;;  %v100_v32 = vld [vmem:[%s776_s1 + $0x50] sm:$0xff]  ;;  %v109_v34 = vld [vmem:[%s776_s1 + $0x98] sm:$0xff]  ;;  %v102_v35 = vld [vmem:[%s776_s1 + $0x60] sm:$0xff] }
  0x14   :  { %195 = vmatpush.msra.mxu0 %v61_v44  ;;  %374 = vmatpush.msra.mxu3 %v61_v44  ;;  %v103_v36 = vld [vmem:[%s776_s1 + $0x68] sm:$0xff]  ;;  %v113_v37 = vld [vmem:[%s776_s1 + $0xb8] sm:$0xff]  ;;  %v106_v40 = vld [vmem:[%s776_s1 + $0x80] sm:$0xff] }
  0x15   :  { %236 = vmatpush.msra.mxu1 %v77_v47  ;;  %144 = vperm.xlu2 %401, %v118_v12   ;;  %v105_v39 = vld [vmem:[%s776_s1 + $0x78] sm:$0xff] }
  0x16   :  { %196 = vmatpush.msra.mxu0 %v60_v50  ;;  %375 = vmatpush.msra.mxu3 %v60_v50 }
  0x17   :  { %237 = vmatpush.msra.mxu1 %v76_v52  ;;  %359 = vmatmul.msk.f32.gmra.mxu2 %vm162_vm0, %v95_v56 }
  0x18   :  { %197 = vmatpush.msra.mxu0 %v59_v54  ;;  %376 = vmatpush.msra.mxu3 %v59_v54 }
  0x19   :  { %238 = vmatpush.msra.mxu1 %v75_v57  ;;  %129 = vperm.xlu0 %399, %v115_v3  }
  0x1a   :  { %198 = vmatpush.msra.mxu0 %v58_v59  ;;  %377 = vmatpush.msra.mxu3 %v58_v59 }
  0x1b   :  { %239 = vmatpush.msra.mxu1 %v74_v61  ;;  %139 = vperm.xlu1 %400, %v117_v23  }
  0x1c   :  { %199 = vmatpush.msra.mxu0 %v57_v0  ;;  %378 = vmatpush.msra.mxu3 %v57_v0 }
  0x1d   :  { %240 = vmatpush.msra.mxu1 %v73_v4 }
  0x1e   :  { %200 = vmatpush.msra.mxu0 %v56_v9  ;;  %379 = vmatpush.msra.mxu3 %v56_v9 }
  0x1f   :  { %241 = vmatpush.msra.mxu1 %v72_v13  ;;  %360 = vmatmul.msk.f32.gmra.mxu2 %vm162_vm0, %v98_v17 }
  0x20   :  { %201 = vmatpush.msra.mxu0 %v55_v16  ;;  %380 = vmatpush.msra.mxu3 %v55_v16 }
  0x21   :  { %242 = vmatpush.msra.mxu1 %v71_v18  ;;  %154 = vperm.xlu0 %399, %v120_v30  }
  0x22   :  { %202 = vmatpush.msra.mxu0 %v54_v21  ;;  %381 = vmatpush.msra.mxu3 %v54_v21 }
  0x23   :  { %203 = vmatmul.f32.vlgmr.msra.gmra.mxu0 %v90_v24  ;;  %243 = vmatpush.msra.mxu1 %v70_v25 }
  0x24   :  { %382 = vmatpush.msrb.mxu3 %v85_v5  ;;  %244 = vmatmul.f32.vlgmr.msra.gmra.mxu1 %v91_v29  ;;  %v93_v5 = vld [vmem:[%s776_s1 + $0x18] sm:$0xff] }
  0x25   :  { %221 = vmatmul.f32.vlgmr.msra.gmra.mxu3 %v108_v26  ;;  %159 = vperm.xlu1 %400, %v121_v2  }
  0x26   :  { %383 = vmatpush.msrb.mxu3 %v84_v8  ;;  %v94_v8 = vld [vmem:[%s776_s1 + $0x20] sm:$0xff] }
  0x27   :  { %361 = vmatmul.msk.f32.gmra.mxu2 %vm162_vm0, %v101_v31 }
  0x28   :  { %384 = vmatpush.msrb.mxu3 %v83_v14  ;;  %v96_v14 = vld [vmem:[%s776_s1 + $0x30] sm:$0xff] }
  0x2a   :  { %385 = vmatpush.msrb.mxu3 %v82_v22  ;;  %v119_v22 = vld [vmem:[%s777_s2 + $0x28] sm:$0xff] }
  0x2b   :  { %206 = vmatmul.f32.gmra.mxu0 %v93_v5  ;;  %149 = vperm.xlu2 %401, %v119_v22  }
  0x2c   :  { %386 = vmatpush.msrb.mxu3 %v81_v28  ;;  %247 = vmatmul.f32.gmra.mxu1 %v94_v8  ;;  %v99_v28 = vld [vmem:[%s776_s1 + $0x48] sm:$0xff] }
  0x2d   :  { %224 = vmatmul.f32.gmra.mxu3 %v111_v7 }
  0x2e   :  { %387 = vmatpush.msrb.mxu3 %v80_v33  ;;  %v110_v33 = vld [vmem:[%s776_s1 + $0xa0] sm:$0xff] }
  0x2f   :  { %362 = vmatmul.msk.f32.gmra.mxu2 %vm162_vm0, %v104_v10 }
  0x30   :  { %388 = vmatpush.msrb.mxu3 %v79_v38  ;;  %v112_v38 = vld [vmem:[%s776_s1 + $0xb0] sm:$0xff] }
  0x32   :  { %389 = vmatpush.msrb.mxu3 %v78_v42 }
  0x33   :  { %209 = vmatmul.f32.gmra.mxu0 %v96_v14 }
  0x34   :  { %390 = vmatpush.msrb.mxu3 %v77_v47  ;;  %250 = vmatmul.f32.gmra.mxu1 %v97_v19 }
  0x36   :  { %391 = vmatpush.msrb.mxu3 %v76_v52 }
  0x37   :  { %363 = vmatmul.msk.f32.gmra.mxu2 %vm162_vm0, %v107_v27 }
  0x38   :  { %392 = vmatpush.msrb.mxu3 %v75_v57 }
  0x3a   :  { %393 = vmatpush.msrb.mxu3 %v74_v61 }
  0x3b   :  { %212 = vmatmul.f32.gmra.mxu0 %v99_v28 }
  0x3c   :  { %394 = vmatpush.msrb.mxu3 %v73_v4  ;;  %253 = vmatmul.f32.gmra.mxu1 %v100_v32 }
  0x3e   :  { %395 = vmatpush.msrb.mxu3 %v72_v13 }
  0x3f   :  { %364 = vmatmul.msk.f32.gmra.mxu2 %vm162_vm0, %v110_v33 }
  0x40   :  { %396 = vmatpush.msrb.mxu3 %v71_v18 }
  0x42   :  { %397 = vmatpush.msrb.mxu3 %v70_v25 }
  0x43   :  { %262 = vmatmul.f32.vlgmr.msrb.gmra.mxu3 %v109_v34  ;;  %215 = vmatmul.f32.gmra.mxu0 %v102_v35 }
  0x44   :  { %256 = vmatmul.f32.gmra.mxu1 %v103_v36 }
  0x47   :  { %365 = vmatmul.msk.f32.gmra.mxu2 %vm162_vm0, %v113_v37 }
  0x4b   :  { %265 = vmatmul.f32.gmra.mxu3 %v112_v38  ;;  %218 = vmatmul.f32.gmra.mxu0 %v105_v39 }
  0x4c   :  { %259 = vmatmul.f32.gmra.mxu1 %v106_v40 }
  0x6f   :  { %v145_v63 = vpop.permute.xlu2 %144 }
  0x83   :  { %v125_v49 = vpop.permute.xlu0 %124 }
  0x85   :  { %v135_v54 = vpop.permute.xlu1 %134  ;;  %v150_v7 = vpop.permute.xlu2 %149 }
  0x8b   :  { %v130_v56 = vpop.permute.xlu0 %129 }
  0x8d   :  { %v140_v3 = vpop.permute.xlu1 %139 }
  0x92   :  { %v286_v41 = vpop.f32.mrf.mxu2 }
  0x93   :  { %v155_v6 = vpop.permute.xlu0 %154 }
  0x97   :  { %v160_v12 = vpop.permute.xlu1 %159 }
  0x9a   :  { %v289_v42 = vpop.f32.mrf.mxu2 }
  0xa0   :  { %v204_v43 = vpop.f32.mrf.mxu0 }
  0xa1   :  { %v245_v44 = vpop.f32.mrf.mxu1  ;;  %v205_v59 = vadd.f32 %v204_v43, %v125_v49 }
  0xa2   :  { %v292_v45 = vpop.f32.mrf.mxu2 }
  0xa3   :  { %v246_v0 = vadd.f32 %v245_v44, %v205_v59 }
  0xa5   :  { %v287_v16 = vadd.f32 %v286_v41, %v246_v0 }
  0xa7   :  { %v310_v31 = vmax.f32 %v287_v16, 0.0 }
  0xa8   :  { %v207_v46 = vpop.f32.mrf.mxu0  ;;  %v222_v53 = vpop.f32.mrf.mxu3 }
  0xa9   :  { %v248_v47 = vpop.f32.mrf.mxu1  ;;  %v208_v17 = vadd.f32 %v207_v46, %v130_v56  ;;  %v223_v23 = vadd.f32 %v222_v53, %v155_v6 }
  0xaa   :  { %v295_v48 = vpop.f32.mrf.mxu2 }
  0xab   :  { %v249_v2 = vadd.f32 %v248_v47, %v208_v17 }
  0xad   :  { %v290_v33 = vadd.f32 %v289_v42, %v249_v2 }
  0xaf   :  { %v311_v46 = vmax.f32 %v290_v33, 0.0 }
  0xb0   :  { %v210_v50 = vpop.f32.mrf.mxu0  ;;  %v225_v61 = vpop.f32.mrf.mxu3 }
  0xb1   :  { %v251_v51 = vpop.f32.mrf.mxu1  ;;  %v211_v62 = vadd.f32 %v210_v50, %v135_v54  ;;  %v226_v36 = vadd.f32 %v225_v61, %v160_v12 }
  0xb2   :  { %v298_v52 = vpop.f32.mrf.mxu2 }
  0xb3   :  { %v252_v13 = vadd.f32 %v251_v51, %v211_v62 }
  0xb5   :  { %v293_v26 = vadd.f32 %v292_v45, %v252_v13 }
  0xb7   :  { %v312_v22 = vmax.f32 %v293_v26, 0.0 }
  0xb8   :  { %v213_v55 = vpop.f32.mrf.mxu0 }
  0xb9   :  { %v254_v57 = vpop.f32.mrf.mxu1  ;;  %v214_v29 = vadd.f32 %v213_v55, %v140_v3 }
  0xba   :  { %v301_v58 = vpop.f32.mrf.mxu2 }
  0xbb   :  { %v255_v27 = vadd.f32 %v254_v57, %v214_v29 }
  0xbd   :  { %v296_v43 = vadd.f32 %v295_v48, %v255_v27 }
  0xc0   :  { %v216_v4 = vpop.f32.mrf.mxu0 }
  0xc1   :  { %v217_v9 = vadd.f32 %v216_v4, %v145_v63  ;;  %v257_v15 = vpop.f32.mrf.mxu1 }
  0xc2   :  { %v304_v21 = vpop.f32.mrf.mxu2 }
  0xc3   :  { %v258_v18 = vadd.f32 %v257_v15, %v217_v9 }
  0xc5   :  { %v299_v24 = vadd.f32 %v298_v52, %v258_v18  ;;  %v313_v52 = vmax.f32 %v296_v43, 0.0 }
  0xc6   :  { %v263_v25 = vpop.f32.mrf.mxu3 }
  0xc7   :  { %v264_v30 = vadd.f32 %v263_v25, %v223_v23  ;;  %v314_v5 = vmax.f32 %v299_v24, 0.0 }
  0xc8   :  { %v219_v10 = vpop.f32.mrf.mxu0 }
  0xc9   :  { %v305_v8 = vadd.f32 %v304_v21, %v264_v30  ;;  %v318_v14 = vadd.f32 %v314_v5, %v310_v31  ;;  %v220_v19 = vadd.f32 %v219_v10, %v150_v7  ;;  %v260_v32 = vpop.f32.mrf.mxu1 }
  0xca   :  { %v307_v41 = vpop.f32.mrf.mxu2 }
  0xcb   :  { %v316_v28 = vmax.f32 %v305_v8, 0.0  ;;  %v322_v34 = vsub.f32 0.0, %v318_v14  ;;  %v261_v35 = vadd.f32 %v260_v32, %v220_v19 }
  0xcd   :  { %v320_v37 = vadd.f32 %v316_v28, %v312_v22  ;;  %v326_v38 = vmul.f32 1.442695, %v322_v34  ;;  %v302_v39 = vadd.f32 %v301_v58, %v261_v35 }
  0xce   :  { %v266_v40 = vpop.f32.mrf.mxu3 }
  0xcf   :  { %v324_v44 = vsub.f32 0.0, %v320_v37  ;;  %v267_v45 = vadd.f32 %v266_v40, %v226_v36  ;;  %402 = vpow2.f32 %v326_v38  ;;  %v315_v47 = vmax.f32 %v302_v39, 0.0 }
  0xd1   :  { %v330_v49 = vmul.f32 1.442695, %v324_v44  ;;  %v308_v50 = vadd.f32 %v307_v41, %v267_v45  ;;  %v319_v51 = vadd.f32 %v315_v47, %v311_v46 }
  0xd3   :  { %404 = vpow2.f32 %v330_v49  ;;  %v317_v42 = vmax.f32 %v308_v50, 0.0  ;;  %v323_v53 = vsub.f32 0.0, %v319_v51 }
  0xd5   :  { %v321_v54 = vadd.f32 %v317_v42, %v313_v52  ;;  %v403_v55 = vpop.eup %402  ;;  %v328_v56 = vmul.f32 1.442695, %v323_v53 }
  0xd6   :  { %v334_v57 = vadd.f32 1.0, %v403_v55 }
  0xd7   :  { %v325_v58 = vsub.f32 0.0, %v321_v54  ;;  %406 = vpow2.f32 %v328_v56 }
  0xd8   :  { %408 = vrcp.f32 %v334_v57 }
  0xd9   :  { %v405_v59 = vpop.eup %404  ;;  %v332_v48 = vmul.f32 1.442695, %v325_v58 }
  0xda   :  { %v336_v61 = vadd.f32 1.0, %v405_v59 }
  0xdb   :  { %410 = vpow2.f32 %v332_v48 }
  0xdc   :  { %412 = vrcp.f32 %v336_v61 }
  0xdd   :  { %v407_v62 = vpop.eup %406 }
  0xde   :  { %v409_v63 = vpop.eup %408  ;;  %v335_v0 = vadd.f32 1.0, %v407_v62 }
  0xdf   :  { %v342_v3 = vmul.f32 %v409_v63, %v318_v14 }
  0xe0   :  { %414 = vrcp.f32 %v335_v0 }
  0xe1   :  { %v411_v4 = vpop.eup %410  ;;  %v346_v9 = vadd.f32 %v342_v3, %v638_v20 }
  0xe2   :  { %v413_v6 = vpop.eup %412  ;;  %v337_v13 = vadd.f32 1.0, %v411_v4 }
  0xe3   :  { %v344_v15 = vmul.f32 %v413_v6, %v320_v37  ;;  %350 = vst [vmem:[%s778_s3] sm:$0xff] %v346_v9 }
  0xe4   :  { %416 = vrcp.f32 %v337_v13 }
  0xe5   :  { %v348_v16 = vadd.f32 %v344_v15, %v607_v1 }
  0xe6   :  { %v415_v17 = vpop.eup %414 }
  0xe7   :  { %352 = vst [vmem:[%s778_s3 + $0x10] sm:$0xff] %v348_v16  ;;  %v343_v18 = vmul.f32 %v415_v17, %v319_v51 }
  0xe9   :  { %v347_v23 = vadd.f32 %v343_v18, %v621_v11 }
  0xea   :  { %v417_v21 = vpop.eup %416 }
  0xeb   :  { %v345_v24 = vmul.f32 %v417_v21, %v321_v54  ;;  %351 = vst [vmem:[%s778_s3 + $0x8] sm:$0xff] %v347_v23 }
  0xed   :  { %v349_v20 = vadd.f32 %v345_v24, %v592_v60 }
  0xef   :  { %353 = vst [vmem:[%s778_s3 + $0x18] sm:$0xff] %v349_v20 }

</bundles_post_ra>
